<compile_context>
chip_gen: v5e
topology: v5e:2x2
jax: 0.10.0
libtpu: 0.0.40
codegen_flags: <defaults>
</compile_context>

<pallas_src>
import numpy as np
import jax
import jax.numpy as jnp
from jax.experimental import pallas as pl
from jax.experimental.pallas import tpu as pltpu

BAG_SIZE = 3
BATCH_SIZE = 4
EMBEDDING_DIM = 4
NUM_EMBEDDINGS = 10
NUM_TABLES = 2
PER_TABLE = BATCH_SIZE * BAG_SIZE          # flat indices per table
OUT_DIM = NUM_TABLES * EMBEDDING_DIM       # concatenated output width


def tbe_kernel(idx_ref, off_ref, w_ref, out_ref):
    """Fused table-batched EmbeddingBag(mode='sum'), single invocation.

    idx_ref : SMEM int32 (NUM_TABLES * PER_TABLE,)  scalar-prefetched indices,
              with the per-table row base (t * NUM_EMBEDDINGS) already folded in.
    off_ref : SMEM int32 (BATCH_SIZE,)              scalar-prefetched offsets
    w_ref   : VMEM f32   (NUM_TABLES * NUM_EMBEDDINGS, EMBEDDING_DIM)
    out_ref : VMEM f32   (BATCH_SIZE, NUM_TABLES * EMBEDDING_DIM)

    For each (table t, bag b) we run a STATIC BAG_SIZE-step gather loop over
    positions [offsets[b], offsets[b]+BAG_SIZE), mask out positions past the
    bag end, and accumulate on the VPU. The full (BATCH, OUT_DIM) result is
    assembled in values and written with one store.

    Behavioral notes:
      * bags are assumed to contain at most BAG_SIZE elements (guaranteed by
        the module: indices.view(num_tables, batch, bag_size) with
        offsets = arange(batch) * bag_size).
      * offsets are assumed nondecreasing with offsets[0] == 0 (PyTorch
        EmbeddingBag contract); empty bags produce zeros.
      * out-of-range indices read whatever row the slice lands on instead of
        raising like PyTorch; inputs here are guaranteed in-range.
        # TODO(synk): optional pl.debug_check on row bounds under
        # pl.enable_debug_checks().
    """
    table_blocks = []
    for t in range(NUM_TABLES):                       # unrolled: 2 tables
        idx_base = t * PER_TABLE
        bag_rows = []
        for b in range(BATCH_SIZE):                   # unrolled: 4 bags
            start = off_ref[b]
            if b + 1 < BATCH_SIZE:
                end = off_ref[b + 1]
            else:
                end = jnp.int32(PER_TABLE)            # last bag runs to the end

            acc = jnp.zeros((1, EMBEDDING_DIM), jnp.float32)
            for j in range(BAG_SIZE):                 # static masked loop
                pos = start + j
                valid = pos < end
                # clamp so the SMEM scalar read never goes out of bounds,
                # the gathered row is masked off below when invalid
                safe_pos = jnp.minimum(pos, PER_TABLE - 1)
                row = idx_ref[idx_base + safe_pos]    # fused table+row index
                gathered = w_ref[pl.ds(row, 1), :]    # (1, EMBEDDING_DIM)
                acc = acc + jnp.where(valid, gathered, 0.0)
            bag_rows.append(acc)
        table_blocks.append(jnp.concatenate(bag_rows, axis=0))   # (BATCH, DIM)

    # single full-block store in the concatenated output layout
    out_ref[...] = jnp.concatenate(table_blocks, axis=1)         # (BATCH, OUT_DIM)


def table_batch_embedding(indices, offsets, weights):
    """indices: int (NUM_TABLES*BATCH*BAG,), offsets: int (BATCH,),
    weights: f32 (NUM_TABLES, NUM_EMBEDDINGS, EMBEDDING_DIM).
    Returns f32 (BATCH_SIZE, NUM_TABLES * EMBEDDING_DIM)."""
    # fold the per-table row base into the indices (perf review item #3)
    idx = indices.astype(jnp.int32).reshape(NUM_TABLES, PER_TABLE)
    idx = idx + (jnp.arange(NUM_TABLES, dtype=jnp.int32) * NUM_EMBEDDINGS)[:, None]
    idx = idx.reshape(NUM_TABLES * PER_TABLE)

    off = offsets.astype(jnp.int32).reshape(BATCH_SIZE)
    w2d = weights.astype(jnp.float32).reshape(
        NUM_TABLES * NUM_EMBEDDINGS, EMBEDDING_DIM)

    return pl.pallas_call(
        tbe_kernel,
        out_shape=jax.ShapeDtypeStruct((BATCH_SIZE, OUT_DIM), jnp.float32),
        grid_spec=pltpu.PrefetchScalarGridSpec(
            num_scalar_prefetch=2,          # indices, offsets -> SMEM
            grid=(1,),                      # single fused invocation
            in_specs=[
                # full (tiny) weight slab, block == full array
                pl.BlockSpec((NUM_TABLES * NUM_EMBEDDINGS, EMBEDDING_DIM),
                             lambda i, idx_r, off_r: (0, 0)),
            ],
            out_specs=pl.BlockSpec((BATCH_SIZE, OUT_DIM),
                                   lambda i, idx_r, off_r: (0, 0)),
        ),
    )(idx, off, w2d)


def reference(indices, offsets, weights):
    """Pure-numpy EmbeddingBag(mode='sum') + concat reference."""
    indices = np.asarray(indices).reshape(NUM_TABLES, PER_TABLE)
    offsets = np.asarray(offsets)
    weights = np.asarray(weights).reshape(
        NUM_TABLES, NUM_EMBEDDINGS, EMBEDDING_DIM)
    out = np.zeros((BATCH_SIZE, OUT_DIM), np.float32)
    for t in range(NUM_TABLES):
        for b in range(BATCH_SIZE):
            start = int(offsets[b])
            end = int(offsets[b + 1]) if b + 1 < BATCH_SIZE else PER_TABLE
            acc = np.zeros((EMBEDDING_DIM,), np.float32)
            for j in range(start, end):
                acc += weights[t, indices[t, j]]
            out[b, t * EMBEDDING_DIM:(t + 1) * EMBEDDING_DIM] = acc
    return out


if __name__ == "__main__":
    key = jax.random.PRNGKey(0)
    k_idx, k_w = jax.random.split(key)

    # EmbeddingBag default init: N(0, 1)
    weights = jax.random.normal(
        k_w, (NUM_TABLES, NUM_EMBEDDINGS, EMBEDDING_DIM), dtype=jnp.float32)

    indices = jax.random.randint(
        k_idx, (NUM_TABLES * BATCH_SIZE * BAG_SIZE,), 0, NUM_EMBEDDINGS,
        dtype=jnp.int32)
    offsets = jnp.arange(BATCH_SIZE, dtype=jnp.int32) * BAG_SIZE  # [0, 3, 6, 9]

    out = table_batch_embedding(indices, offsets, weights)
    out = jax.block_until_ready(out)

    ref = reference(indices, offsets, weights)
    assert out.shape == (BATCH_SIZE, OUT_DIM)
    np.testing.assert_allclose(np.asarray(out), ref, rtol=1e-5, atol=1e-5)

    print("KERNEL_OK")
</pallas_src>

<mosaic_0001>
module attributes {stable_mosaic.version = 11 : i64} {
  func.func @tbe_kernel(%arg0: i32, %arg1: memref<24xi32, #tpu.memory_space<smem>>, %arg2: memref<4xi32, #tpu.memory_space<smem>>, %arg3: memref<20x4xf32, #tpu.memory_space<vmem>>, %arg4: memref<4x8xf32, #tpu.memory_space<vmem>>) attributes {dimension_semantics = [#tpu.dimension_semantics<arbitrary>], iteration_bounds = array<i64: 1>, scalar_prefetch = 2 : i64, scratch_operands = 0 : i64, tpu.core_type = #tpu.core_type<tc>, window_params = [{pipeline_mode = #tpu.pipeline_mode<synchronous>, transform_indices = @transform_0, window_bounds = array<i64: 20, 4>}, {pipeline_mode = #tpu.pipeline_mode<synchronous>, transform_indices = @transform_1, window_bounds = array<i64: 4, 8>}]} {
    %c0 = arith.constant 0 : index
    %0 = memref.load %arg2[%c0] : memref<4xi32, #tpu.memory_space<smem>>
    %c1 = arith.constant 1 : index
    %1 = memref.load %arg2[%c1] : memref<4xi32, #tpu.memory_space<smem>>
    %cst = arith.constant 0.000000e+00 : f32
    %2 = vector.broadcast %cst : f32 to vector<1x4xf32>
    %c0_i32 = arith.constant 0 : i32
    %3 = arith.addi %0, %c0_i32 : i32
    %4 = arith.cmpi slt, %3, %1 : i32
    %c11_i32 = arith.constant 11 : i32
    %5 = arith.minsi %3, %c11_i32 : i32
    %c0_i32_0 = arith.constant 0 : i32
    %6 = arith.addi %c0_i32_0, %5 : i32
    %7 = arith.index_cast %6 : i32 to index
    %8 = memref.load %arg1[%7] : memref<24xi32, #tpu.memory_space<smem>>
    %9 = arith.index_cast %8 : i32 to index
    %c0_1 = arith.constant 0 : index
    %10 = vector.load %arg3[%9, %c0_1] : memref<20x4xf32, #tpu.memory_space<vmem>>, vector<1x4xf32>
    %cst_2 = arith.constant 0.000000e+00 : f32
    %11 = vector.broadcast %cst_2 : f32 to vector<1x4xf32>
    %12 = arith.select %4, %10, %11 : vector<1x4xf32>
    %13 = arith.addf %2, %12 : vector<1x4xf32>
    %c1_i32 = arith.constant 1 : i32
    %14 = arith.addi %0, %c1_i32 : i32
    %15 = arith.cmpi slt, %14, %1 : i32
    %c11_i32_3 = arith.constant 11 : i32
    %16 = arith.minsi %14, %c11_i32_3 : i32
    %c0_i32_4 = arith.constant 0 : i32
    %17 = arith.addi %c0_i32_4, %16 : i32
    %18 = arith.index_cast %17 : i32 to index
    %19 = memref.load %arg1[%18] : memref<24xi32, #tpu.memory_space<smem>>
    %20 = arith.index_cast %19 : i32 to index
    %c0_5 = arith.constant 0 : index
    %21 = vector.load %arg3[%20, %c0_5] : memref<20x4xf32, #tpu.memory_space<vmem>>, vector<1x4xf32>
    %cst_6 = arith.constant 0.000000e+00 : f32
    %22 = vector.broadcast %cst_6 : f32 to vector<1x4xf32>
    %23 = arith.select %15, %21, %22 : vector<1x4xf32>
    %24 = arith.addf %13, %23 : vector<1x4xf32>
    %c2_i32 = arith.constant 2 : i32
    %25 = arith.addi %0, %c2_i32 : i32
    %26 = arith.cmpi slt, %25, %1 : i32
    %c11_i32_7 = arith.constant 11 : i32
    %27 = arith.minsi %25, %c11_i32_7 : i32
    %c0_i32_8 = arith.constant 0 : i32
    %28 = arith.addi %c0_i32_8, %27 : i32
    %29 = arith.index_cast %28 : i32 to index
    %30 = memref.load %arg1[%29] : memref<24xi32, #tpu.memory_space<smem>>
    %31 = arith.index_cast %30 : i32 to index
    %c0_9 = arith.constant 0 : index
    %32 = vector.load %arg3[%31, %c0_9] : memref<20x4xf32, #tpu.memory_space<vmem>>, vector<1x4xf32>
    %cst_10 = arith.constant 0.000000e+00 : f32
    %33 = vector.broadcast %cst_10 : f32 to vector<1x4xf32>
    %34 = arith.select %26, %32, %33 : vector<1x4xf32>
    %35 = arith.addf %24, %34 : vector<1x4xf32>
    %c1_11 = arith.constant 1 : index
    %36 = memref.load %arg2[%c1_11] : memref<4xi32, #tpu.memory_space<smem>>
    %c2 = arith.constant 2 : index
    %37 = memref.load %arg2[%c2] : memref<4xi32, #tpu.memory_space<smem>>
    %cst_12 = arith.constant 0.000000e+00 : f32
    %38 = vector.broadcast %cst_12 : f32 to vector<1x4xf32>
    %c0_i32_13 = arith.constant 0 : i32
    %39 = arith.addi %36, %c0_i32_13 : i32
    %40 = arith.cmpi slt, %39, %37 : i32
    %c11_i32_14 = arith.constant 11 : i32
    %41 = arith.minsi %39, %c11_i32_14 : i32
    %c0_i32_15 = arith.constant 0 : i32
    %42 = arith.addi %c0_i32_15, %41 : i32
    %43 = arith.index_cast %42 : i32 to index
    %44 = memref.load %arg1[%43] : memref<24xi32, #tpu.memory_space<smem>>
    %45 = arith.index_cast %44 : i32 to index
    %c0_16 = arith.constant 0 : index
    %46 = vector.load %arg3[%45, %c0_16] : memref<20x4xf32, #tpu.memory_space<vmem>>, vector<1x4xf32>
    %cst_17 = arith.constant 0.000000e+00 : f32
    %47 = vector.broadcast %cst_17 : f32 to vector<1x4xf32>
    %48 = arith.select %40, %46, %47 : vector<1x4xf32>
    %49 = arith.addf %38, %48 : vector<1x4xf32>
    %c1_i32_18 = arith.constant 1 : i32
    %50 = arith.addi %36, %c1_i32_18 : i32
    %51 = arith.cmpi slt, %50, %37 : i32
    %c11_i32_19 = arith.constant 11 : i32
    %52 = arith.minsi %50, %c11_i32_19 : i32
    %c0_i32_20 = arith.constant 0 : i32
    %53 = arith.addi %c0_i32_20, %52 : i32
    %54 = arith.index_cast %53 : i32 to index
    %55 = memref.load %arg1[%54] : memref<24xi32, #tpu.memory_space<smem>>
    %56 = arith.index_cast %55 : i32 to index
    %c0_21 = arith.constant 0 : index
    %57 = vector.load %arg3[%56, %c0_21] : memref<20x4xf32, #tpu.memory_space<vmem>>, vector<1x4xf32>
    %cst_22 = arith.constant 0.000000e+00 : f32
    %58 = vector.broadcast %cst_22 : f32 to vector<1x4xf32>
    %59 = arith.select %51, %57, %58 : vector<1x4xf32>
    %60 = arith.addf %49, %59 : vector<1x4xf32>
    %c2_i32_23 = arith.constant 2 : i32
    %61 = arith.addi %36, %c2_i32_23 : i32
    %62 = arith.cmpi slt, %61, %37 : i32
    %c11_i32_24 = arith.constant 11 : i32
    %63 = arith.minsi %61, %c11_i32_24 : i32
    %c0_i32_25 = arith.constant 0 : i32
    %64 = arith.addi %c0_i32_25, %63 : i32
    %65 = arith.index_cast %64 : i32 to index
    %66 = memref.load %arg1[%65] : memref<24xi32, #tpu.memory_space<smem>>
    %67 = arith.index_cast %66 : i32 to index
    %c0_26 = arith.constant 0 : index
    %68 = vector.load %arg3[%67, %c0_26] : memref<20x4xf32, #tpu.memory_space<vmem>>, vector<1x4xf32>
    %cst_27 = arith.constant 0.000000e+00 : f32
    %69 = vector.broadcast %cst_27 : f32 to vector<1x4xf32>
    %70 = arith.select %62, %68, %69 : vector<1x4xf32>
    %71 = arith.addf %60, %70 : vector<1x4xf32>
    %c2_28 = arith.constant 2 : index
    %72 = memref.load %arg2[%c2_28] : memref<4xi32, #tpu.memory_space<smem>>
    %c3 = arith.constant 3 : index
    %73 = memref.load %arg2[%c3] : memref<4xi32, #tpu.memory_space<smem>>
    %cst_29 = arith.constant 0.000000e+00 : f32
    %74 = vector.broadcast %cst_29 : f32 to vector<1x4xf32>
    %c0_i32_30 = arith.constant 0 : i32
    %75 = arith.addi %72, %c0_i32_30 : i32
    %76 = arith.cmpi slt, %75, %73 : i32
    %c11_i32_31 = arith.constant 11 : i32
    %77 = arith.minsi %75, %c11_i32_31 : i32
    %c0_i32_32 = arith.constant 0 : i32
    %78 = arith.addi %c0_i32_32, %77 : i32
    %79 = arith.index_cast %78 : i32 to index
    %80 = memref.load %arg1[%79] : memref<24xi32, #tpu.memory_space<smem>>
    %81 = arith.index_cast %80 : i32 to index
    %c0_33 = arith.constant 0 : index
    %82 = vector.load %arg3[%81, %c0_33] : memref<20x4xf32, #tpu.memory_space<vmem>>, vector<1x4xf32>
    %cst_34 = arith.constant 0.000000e+00 : f32
    %83 = vector.broadcast %cst_34 : f32 to vector<1x4xf32>
    %84 = arith.select %76, %82, %83 : vector<1x4xf32>
    %85 = arith.addf %74, %84 : vector<1x4xf32>
    %c1_i32_35 = arith.constant 1 : i32
    %86 = arith.addi %72, %c1_i32_35 : i32
    %87 = arith.cmpi slt, %86, %73 : i32
    %c11_i32_36 = arith.constant 11 : i32
    %88 = arith.minsi %86, %c11_i32_36 : i32
    %c0_i32_37 = arith.constant 0 : i32
    %89 = arith.addi %c0_i32_37, %88 : i32
    %90 = arith.index_cast %89 : i32 to index
    %91 = memref.load %arg1[%90] : memref<24xi32, #tpu.memory_space<smem>>
    %92 = arith.index_cast %91 : i32 to index
    %c0_38 = arith.constant 0 : index
    %93 = vector.load %arg3[%92, %c0_38] : memref<20x4xf32, #tpu.memory_space<vmem>>, vector<1x4xf32>
    %cst_39 = arith.constant 0.000000e+00 : f32
    %94 = vector.broadcast %cst_39 : f32 to vector<1x4xf32>
    %95 = arith.select %87, %93, %94 : vector<1x4xf32>
    %96 = arith.addf %85, %95 : vector<1x4xf32>
    %c2_i32_40 = arith.constant 2 : i32
    %97 = arith.addi %72, %c2_i32_40 : i32
    %98 = arith.cmpi slt, %97, %73 : i32
    %c11_i32_41 = arith.constant 11 : i32
    %99 = arith.minsi %97, %c11_i32_41 : i32
    %c0_i32_42 = arith.constant 0 : i32
    %100 = arith.addi %c0_i32_42, %99 : i32
    %101 = arith.index_cast %100 : i32 to index
    %102 = memref.load %arg1[%101] : memref<24xi32, #tpu.memory_space<smem>>
    %103 = arith.index_cast %102 : i32 to index
    %c0_43 = arith.constant 0 : index
    %104 = vector.load %arg3[%103, %c0_43] : memref<20x4xf32, #tpu.memory_space<vmem>>, vector<1x4xf32>
    %cst_44 = arith.constant 0.000000e+00 : f32
    %105 = vector.broadcast %cst_44 : f32 to vector<1x4xf32>
    %106 = arith.select %98, %104, %105 : vector<1x4xf32>
    %107 = arith.addf %96, %106 : vector<1x4xf32>
    %c3_45 = arith.constant 3 : index
    %108 = memref.load %arg2[%c3_45] : memref<4xi32, #tpu.memory_space<smem>>
    %cst_46 = arith.constant 0.000000e+00 : f32
    %109 = vector.broadcast %cst_46 : f32 to vector<1x4xf32>
    %c0_i32_47 = arith.constant 0 : i32
    %110 = arith.addi %108, %c0_i32_47 : i32
    %c12_i32 = arith.constant 12 : i32
    %111 = arith.cmpi slt, %110, %c12_i32 : i32
    %c11_i32_48 = arith.constant 11 : i32
    %112 = arith.minsi %110, %c11_i32_48 : i32
    %c0_i32_49 = arith.constant 0 : i32
    %113 = arith.addi %c0_i32_49, %112 : i32
    %114 = arith.index_cast %113 : i32 to index
    %115 = memref.load %arg1[%114] : memref<24xi32, #tpu.memory_space<smem>>
    %116 = arith.index_cast %115 : i32 to index
    %c0_50 = arith.constant 0 : index
    %117 = vector.load %arg3[%116, %c0_50] : memref<20x4xf32, #tpu.memory_space<vmem>>, vector<1x4xf32>
    %cst_51 = arith.constant 0.000000e+00 : f32
    %118 = vector.broadcast %cst_51 : f32 to vector<1x4xf32>
    %119 = arith.select %111, %117, %118 : vector<1x4xf32>
    %120 = arith.addf %109, %119 : vector<1x4xf32>
    %c1_i32_52 = arith.constant 1 : i32
    %121 = arith.addi %108, %c1_i32_52 : i32
    %c12_i32_53 = arith.constant 12 : i32
    %122 = arith.cmpi slt, %121, %c12_i32_53 : i32
    %c11_i32_54 = arith.constant 11 : i32
    %123 = arith.minsi %121, %c11_i32_54 : i32
    %c0_i32_55 = arith.constant 0 : i32
    %124 = arith.addi %c0_i32_55, %123 : i32
    %125 = arith.index_cast %124 : i32 to index
    %126 = memref.load %arg1[%125] : memref<24xi32, #tpu.memory_space<smem>>
    %127 = arith.index_cast %126 : i32 to index
    %c0_56 = arith.constant 0 : index
    %128 = vector.load %arg3[%127, %c0_56] : memref<20x4xf32, #tpu.memory_space<vmem>>, vector<1x4xf32>
    %cst_57 = arith.constant 0.000000e+00 : f32
    %129 = vector.broadcast %cst_57 : f32 to vector<1x4xf32>
    %130 = arith.select %122, %128, %129 : vector<1x4xf32>
    %131 = arith.addf %120, %130 : vector<1x4xf32>
    %c2_i32_58 = arith.constant 2 : i32
    %132 = arith.addi %108, %c2_i32_58 : i32
    %c12_i32_59 = arith.constant 12 : i32
    %133 = arith.cmpi slt, %132, %c12_i32_59 : i32
    %c11_i32_60 = arith.constant 11 : i32
    %134 = arith.minsi %132, %c11_i32_60 : i32
    %c0_i32_61 = arith.constant 0 : i32
    %135 = arith.addi %c0_i32_61, %134 : i32
    %136 = arith.index_cast %135 : i32 to index
    %137 = memref.load %arg1[%136] : memref<24xi32, #tpu.memory_space<smem>>
    %138 = arith.index_cast %137 : i32 to index
    %c0_62 = arith.constant 0 : index
    %139 = vector.load %arg3[%138, %c0_62] : memref<20x4xf32, #tpu.memory_space<vmem>>, vector<1x4xf32>
    %cst_63 = arith.constant 0.000000e+00 : f32
    %140 = vector.broadcast %cst_63 : f32 to vector<1x4xf32>
    %141 = arith.select %133, %139, %140 : vector<1x4xf32>
    %142 = arith.addf %131, %141 : vector<1x4xf32>
    %143 = tpu.concatenate %35, %71, %107, %142 in 0 : vector<1x4xf32>, vector<1x4xf32>, vector<1x4xf32>, vector<1x4xf32> -> vector<4x4xf32>
    %c0_64 = arith.constant 0 : index
    %144 = memref.load %arg2[%c0_64] : memref<4xi32, #tpu.memory_space<smem>>
    %c1_65 = arith.constant 1 : index
    %145 = memref.load %arg2[%c1_65] : memref<4xi32, #tpu.memory_space<smem>>
    %cst_66 = arith.constant 0.000000e+00 : f32
    %146 = vector.broadcast %cst_66 : f32 to vector<1x4xf32>
    %c0_i32_67 = arith.constant 0 : i32
    %147 = arith.addi %144, %c0_i32_67 : i32
    %148 = arith.cmpi slt, %147, %145 : i32
    %c11_i32_68 = arith.constant 11 : i32
    %149 = arith.minsi %147, %c11_i32_68 : i32
    %c12_i32_69 = arith.constant 12 : i32
    %150 = arith.addi %c12_i32_69, %149 : i32
    %151 = arith.index_cast %150 : i32 to index
    %152 = memref.load %arg1[%151] : memref<24xi32, #tpu.memory_space<smem>>
    %153 = arith.index_cast %152 : i32 to index
    %c0_70 = arith.constant 0 : index
    %154 = vector.load %arg3[%153, %c0_70] : memref<20x4xf32, #tpu.memory_space<vmem>>, vector<1x4xf32>
    %cst_71 = arith.constant 0.000000e+00 : f32
    %155 = vector.broadcast %cst_71 : f32 to vector<1x4xf32>
    %156 = arith.select %148, %154, %155 : vector<1x4xf32>
    %157 = arith.addf %146, %156 : vector<1x4xf32>
    %c1_i32_72 = arith.constant 1 : i32
    %158 = arith.addi %144, %c1_i32_72 : i32
    %159 = arith.cmpi slt, %158, %145 : i32
    %c11_i32_73 = arith.constant 11 : i32
    %160 = arith.minsi %158, %c11_i32_73 : i32
    %c12_i32_74 = arith.constant 12 : i32
    %161 = arith.addi %c12_i32_74, %160 : i32
    %162 = arith.index_cast %161 : i32 to index
    %163 = memref.load %arg1[%162] : memref<24xi32, #tpu.memory_space<smem>>
    %164 = arith.index_cast %163 : i32 to index
    %c0_75 = arith.constant 0 : index
    %165 = vector.load %arg3[%164, %c0_75] : memref<20x4xf32, #tpu.memory_space<vmem>>, vector<1x4xf32>
    %cst_76 = arith.constant 0.000000e+00 : f32
    %166 = vector.broadcast %cst_76 : f32 to vector<1x4xf32>
    %167 = arith.select %159, %165, %166 : vector<1x4xf32>
    %168 = arith.addf %157, %167 : vector<1x4xf32>
    %c2_i32_77 = arith.constant 2 : i32
    %169 = arith.addi %144, %c2_i32_77 : i32
    %170 = arith.cmpi slt, %169, %145 : i32
    %c11_i32_78 = arith.constant 11 : i32
    %171 = arith.minsi %169, %c11_i32_78 : i32
    %c12_i32_79 = arith.constant 12 : i32
    %172 = arith.addi %c12_i32_79, %171 : i32
    %173 = arith.index_cast %172 : i32 to index
    %174 = memref.load %arg1[%173] : memref<24xi32, #tpu.memory_space<smem>>
    %175 = arith.index_cast %174 : i32 to index
    %c0_80 = arith.constant 0 : index
    %176 = vector.load %arg3[%175, %c0_80] : memref<20x4xf32, #tpu.memory_space<vmem>>, vector<1x4xf32>
    %cst_81 = arith.constant 0.000000e+00 : f32
    %177 = vector.broadcast %cst_81 : f32 to vector<1x4xf32>
    %178 = arith.select %170, %176, %177 : vector<1x4xf32>
    %179 = arith.addf %168, %178 : vector<1x4xf32>
    %c1_82 = arith.constant 1 : index
    %180 = memref.load %arg2[%c1_82] : memref<4xi32, #tpu.memory_space<smem>>
    %c2_83 = arith.constant 2 : index
    %181 = memref.load %arg2[%c2_83] : memref<4xi32, #tpu.memory_space<smem>>
    %cst_84 = arith.constant 0.000000e+00 : f32
    %182 = vector.broadcast %cst_84 : f32 to vector<1x4xf32>
    %c0_i32_85 = arith.constant 0 : i32
    %183 = arith.addi %180, %c0_i32_85 : i32
    %184 = arith.cmpi slt, %183, %181 : i32
    %c11_i32_86 = arith.constant 11 : i32
    %185 = arith.minsi %183, %c11_i32_86 : i32
    %c12_i32_87 = arith.constant 12 : i32
    %186 = arith.addi %c12_i32_87, %185 : i32
    %187 = arith.index_cast %186 : i32 to index
    %188 = memref.load %arg1[%187] : memref<24xi32, #tpu.memory_space<smem>>
    %189 = arith.index_cast %188 : i32 to index
    %c0_88 = arith.constant 0 : index
    %190 = vector.load %arg3[%189, %c0_88] : memref<20x4xf32, #tpu.memory_space<vmem>>, vector<1x4xf32>
    %cst_89 = arith.constant 0.000000e+00 : f32
    %191 = vector.broadcast %cst_89 : f32 to vector<1x4xf32>
    %192 = arith.select %184, %190, %191 : vector<1x4xf32>
    %193 = arith.addf %182, %192 : vector<1x4xf32>
    %c1_i32_90 = arith.constant 1 : i32
    %194 = arith.addi %180, %c1_i32_90 : i32
    %195 = arith.cmpi slt, %194, %181 : i32
    %c11_i32_91 = arith.constant 11 : i32
    %196 = arith.minsi %194, %c11_i32_91 : i32
    %c12_i32_92 = arith.constant 12 : i32
    %197 = arith.addi %c12_i32_92, %196 : i32
    %198 = arith.index_cast %197 : i32 to index
    %199 = memref.load %arg1[%198] : memref<24xi32, #tpu.memory_space<smem>>
    %200 = arith.index_cast %199 : i32 to index
    %c0_93 = arith.constant 0 : index
    %201 = vector.load %arg3[%200, %c0_93] : memref<20x4xf32, #tpu.memory_space<vmem>>, vector<1x4xf32>
    %cst_94 = arith.constant 0.000000e+00 : f32
    %202 = vector.broadcast %cst_94 : f32 to vector<1x4xf32>
    %203 = arith.select %195, %201, %202 : vector<1x4xf32>
    %204 = arith.addf %193, %203 : vector<1x4xf32>
    %c2_i32_95 = arith.constant 2 : i32
    %205 = arith.addi %180, %c2_i32_95 : i32
    %206 = arith.cmpi slt, %205, %181 : i32
    %c11_i32_96 = arith.constant 11 : i32
    %207 = arith.minsi %205, %c11_i32_96 : i32
    %c12_i32_97 = arith.constant 12 : i32
    %208 = arith.addi %c12_i32_97, %207 : i32
    %209 = arith.index_cast %208 : i32 to index
    %210 = memref.load %arg1[%209] : memref<24xi32, #tpu.memory_space<smem>>
    %211 = arith.index_cast %210 : i32 to index
    %c0_98 = arith.constant 0 : index
    %212 = vector.load %arg3[%211, %c0_98] : memref<20x4xf32, #tpu.memory_space<vmem>>, vector<1x4xf32>
    %cst_99 = arith.constant 0.000000e+00 : f32
    %213 = vector.broadcast %cst_99 : f32 to vector<1x4xf32>
    %214 = arith.select %206, %212, %213 : vector<1x4xf32>
    %215 = arith.addf %204, %214 : vector<1x4xf32>
    %c2_100 = arith.constant 2 : index
    %216 = memref.load %arg2[%c2_100] : memref<4xi32, #tpu.memory_space<smem>>
    %c3_101 = arith.constant 3 : index
    %217 = memref.load %arg2[%c3_101] : memref<4xi32, #tpu.memory_space<smem>>
    %cst_102 = arith.constant 0.000000e+00 : f32
    %218 = vector.broadcast %cst_102 : f32 to vector<1x4xf32>
    %c0_i32_103 = arith.constant 0 : i32
    %219 = arith.addi %216, %c0_i32_103 : i32
    %220 = arith.cmpi slt, %219, %217 : i32
    %c11_i32_104 = arith.constant 11 : i32
    %221 = arith.minsi %219, %c11_i32_104 : i32
    %c12_i32_105 = arith.constant 12 : i32
    %222 = arith.addi %c12_i32_105, %221 : i32
    %223 = arith.index_cast %222 : i32 to index
    %224 = memref.load %arg1[%223] : memref<24xi32, #tpu.memory_space<smem>>
    %225 = arith.index_cast %224 : i32 to index
    %c0_106 = arith.constant 0 : index
    %226 = vector.load %arg3[%225, %c0_106] : memref<20x4xf32, #tpu.memory_space<vmem>>, vector<1x4xf32>
    %cst_107 = arith.constant 0.000000e+00 : f32
    %227 = vector.broadcast %cst_107 : f32 to vector<1x4xf32>
    %228 = arith.select %220, %226, %227 : vector<1x4xf32>
    %229 = arith.addf %218, %228 : vector<1x4xf32>
    %c1_i32_108 = arith.constant 1 : i32
    %230 = arith.addi %216, %c1_i32_108 : i32
    %231 = arith.cmpi slt, %230, %217 : i32
    %c11_i32_109 = arith.constant 11 : i32
    %232 = arith.minsi %230, %c11_i32_109 : i32
    %c12_i32_110 = arith.constant 12 : i32
    %233 = arith.addi %c12_i32_110, %232 : i32
    %234 = arith.index_cast %233 : i32 to index
    %235 = memref.load %arg1[%234] : memref<24xi32, #tpu.memory_space<smem>>
    %236 = arith.index_cast %235 : i32 to index
    %c0_111 = arith.constant 0 : index
    %237 = vector.load %arg3[%236, %c0_111] : memref<20x4xf32, #tpu.memory_space<vmem>>, vector<1x4xf32>
    %cst_112 = arith.constant 0.000000e+00 : f32
    %238 = vector.broadcast %cst_112 : f32 to vector<1x4xf32>
    %239 = arith.select %231, %237, %238 : vector<1x4xf32>
    %240 = arith.addf %229, %239 : vector<1x4xf32>
    %c2_i32_113 = arith.constant 2 : i32
    %241 = arith.addi %216, %c2_i32_113 : i32
    %242 = arith.cmpi slt, %241, %217 : i32
    %c11_i32_114 = arith.constant 11 : i32
    %243 = arith.minsi %241, %c11_i32_114 : i32
    %c12_i32_115 = arith.constant 12 : i32
    %244 = arith.addi %c12_i32_115, %243 : i32
    %245 = arith.index_cast %244 : i32 to index
    %246 = memref.load %arg1[%245] : memref<24xi32, #tpu.memory_space<smem>>
    %247 = arith.index_cast %246 : i32 to index
    %c0_116 = arith.constant 0 : index
    %248 = vector.load %arg3[%247, %c0_116] : memref<20x4xf32, #tpu.memory_space<vmem>>, vector<1x4xf32>
    %cst_117 = arith.constant 0.000000e+00 : f32
    %249 = vector.broadcast %cst_117 : f32 to vector<1x4xf32>
    %250 = arith.select %242, %248, %249 : vector<1x4xf32>
    %251 = arith.addf %240, %250 : vector<1x4xf32>
    %c3_118 = arith.constant 3 : index
    %252 = memref.load %arg2[%c3_118] : memref<4xi32, #tpu.memory_space<smem>>
    %cst_119 = arith.constant 0.000000e+00 : f32
    %253 = vector.broadcast %cst_119 : f32 to vector<1x4xf32>
    %c0_i32_120 = arith.constant 0 : i32
    %254 = arith.addi %252, %c0_i32_120 : i32
    %c12_i32_121 = arith.constant 12 : i32
    %255 = arith.cmpi slt, %254, %c12_i32_121 : i32
    %c11_i32_122 = arith.constant 11 : i32
    %256 = arith.minsi %254, %c11_i32_122 : i32
    %c12_i32_123 = arith.constant 12 : i32
    %257 = arith.addi %c12_i32_123, %256 : i32
    %258 = arith.index_cast %257 : i32 to index
    %259 = memref.load %arg1[%258] : memref<24xi32, #tpu.memory_space<smem>>
    %260 = arith.index_cast %259 : i32 to index
    %c0_124 = arith.constant 0 : index
    %261 = vector.load %arg3[%260, %c0_124] : memref<20x4xf32, #tpu.memory_space<vmem>>, vector<1x4xf32>
    %cst_125 = arith.constant 0.000000e+00 : f32
    %262 = vector.broadcast %cst_125 : f32 to vector<1x4xf32>
    %263 = arith.select %255, %261, %262 : vector<1x4xf32>
    %264 = arith.addf %253, %263 : vector<1x4xf32>
    %c1_i32_126 = arith.constant 1 : i32
    %265 = arith.addi %252, %c1_i32_126 : i32
    %c12_i32_127 = arith.constant 12 : i32
    %266 = arith.cmpi slt, %265, %c12_i32_127 : i32
    %c11_i32_128 = arith.constant 11 : i32
    %267 = arith.minsi %265, %c11_i32_128 : i32
    %c12_i32_129 = arith.constant 12 : i32
    %268 = arith.addi %c12_i32_129, %267 : i32
    %269 = arith.index_cast %268 : i32 to index
    %270 = memref.load %arg1[%269] : memref<24xi32, #tpu.memory_space<smem>>
    %271 = arith.index_cast %270 : i32 to index
    %c0_130 = arith.constant 0 : index
    %272 = vector.load %arg3[%271, %c0_130] : memref<20x4xf32, #tpu.memory_space<vmem>>, vector<1x4xf32>
    %cst_131 = arith.constant 0.000000e+00 : f32
    %273 = vector.broadcast %cst_131 : f32 to vector<1x4xf32>
    %274 = arith.select %266, %272, %273 : vector<1x4xf32>
    %275 = arith.addf %264, %274 : vector<1x4xf32>
    %c2_i32_132 = arith.constant 2 : i32
    %276 = arith.addi %252, %c2_i32_132 : i32
    %c12_i32_133 = arith.constant 12 : i32
    %277 = arith.cmpi slt, %276, %c12_i32_133 : i32
    %c11_i32_134 = arith.constant 11 : i32
    %278 = arith.minsi %276, %c11_i32_134 : i32
    %c12_i32_135 = arith.constant 12 : i32
    %279 = arith.addi %c12_i32_135, %278 : i32
    %280 = arith.index_cast %279 : i32 to index
    %281 = memref.load %arg1[%280] : memref<24xi32, #tpu.memory_space<smem>>
    %282 = arith.index_cast %281 : i32 to index
    %c0_136 = arith.constant 0 : index
    %283 = vector.load %arg3[%282, %c0_136] : memref<20x4xf32, #tpu.memory_space<vmem>>, vector<1x4xf32>
    %cst_137 = arith.constant 0.000000e+00 : f32
    %284 = vector.broadcast %cst_137 : f32 to vector<1x4xf32>
    %285 = arith.select %277, %283, %284 : vector<1x4xf32>
    %286 = arith.addf %275, %285 : vector<1x4xf32>
    %287 = tpu.concatenate %179, %215, %251, %286 in 0 : vector<1x4xf32>, vector<1x4xf32>, vector<1x4xf32>, vector<1x4xf32> -> vector<4x4xf32>
    %288 = tpu.concatenate %143, %287 in 1 : vector<4x4xf32>, vector<4x4xf32> -> vector<4x8xf32>
    %c0_138 = arith.constant 0 : index
    %c0_139 = arith.constant 0 : index
    %289 = vector.load %arg4[%c0_138, %c0_139] : memref<4x8xf32, #tpu.memory_space<vmem>>, vector<4x8xf32>
    tpu.vector_store %arg4[%c0_138, %c0_139], %288 {strides = array<i32>} : memref<4x8xf32, #tpu.memory_space<vmem>>, vector<4x8xf32>,
    return
  }
  func.func @transform_0(%arg0: i32, %arg1: memref<24xi32, #tpu.memory_space<smem>>, %arg2: memref<4xi32, #tpu.memory_space<smem>>) -> (i32, i32) {
    %c0_i32 = arith.constant 0 : i32
    %c0_i32_0 = arith.constant 0 : i32
    %c0_i32_1 = arith.constant 0 : i32
    return %c0_i32, %c0_i32_0 : i32, i32
  }
  func.func @transform_1(%arg0: i32, %arg1: memref<24xi32, #tpu.memory_space<smem>>, %arg2: memref<4xi32, #tpu.memory_space<smem>>) -> (i32, i32) {
    %c0_i32 = arith.constant 0 : i32
    %c0_i32_0 = arith.constant 0 : i32
    %c0_i32_1 = arith.constant 0 : i32
    return %c0_i32, %c0_i32_0 : i32, i32
  }
}

</mosaic_0001>

<bundles_post_ra>
// kernel: tpu_custom_call.1
= control target key start
LH: loop header
LB: loop body
LE: loop exit
PB: predicated region body
PF: predicated region fallthrough
CT: control target
= control target key end

     0   :  { %s374_s18 = smov [#allocation3]   ;;  %s375_s19 = smov [#allocation4]   ;;  %s681_s0 = inlined_call_operand.vmem [shape: s32[24], index: 0, kind: input, shape index: {}]   ;;  %s682_s2 = inlined_call_operand.vmem [shape: f32[20,4], index: 2, kind: input, shape index: {}]   ;;  %s683_s3 = inlined_call_operand.hbm [shape: f32[4,8], index: 3, kind: output, shape index: {}]   ;;  %s684_s1 = inlined_call_operand.vmem [shape: s32[4], index: 1, kind: input, shape index: {}]  }
   0x1   :  { %s9_s14 = sshll.u32 %s681_s0, 4  ;;  %s14_s17 = sshll.u32 %s684_s1, 4  ;;  %s10_s14 = int_to_ptr.vmem [resolvable:$true] %s9_s14  ;;  %s15_s17 = int_to_ptr.vmem [resolvable:$true] %s14_s17 }
   0x2   :  { %12 = dma.vmem_to_smem %s10_s14, 16, %s374_s18, [#allocation2] }
   0x3   :  { %17 = dma.vmem_to_smem %s15_s17, 16, %s375_s19, [#allocation2] }
   0x4   :  { %370 = dma.done.wait [#allocation2], 32 }
   0x5   :  { %371 = vsyncadd [#allocation2], 4294967264 }
   0x6   :  { %20 = sfence }
   0x7   :  { %21 = vsyncpa [#allocation6], 0  ;;  %s24_s20 = sld [smem:[#allocation4]]  ;;  %vm177_vm7 = vcmask 1040384   ;;  %vm179_vm11 = vcmask 1041408   ;;  %vm181_vm14 = vcmask 1042432  }
   0x8   :  { %s404_s21 = sld [smem:[#allocation4 + $0x1]]  ;;  %vm271_vm15 = vcmask 31744  }
   0x9   :  { %s406_s0 = sld [smem:[#allocation4 + $0x2]] }
   0xa   :  { %s408_s1 = sld [smem:[#allocation4 + $0x3]] }
   0xd   :  { %p27_p0 = scmp.lt.s32.totalorder %s24_s20, 11  ;;  %s37_s22 = sadd.s32 1, %s24_s20 }
   0xe   :  { %p26_p1 = scmp.lt.s32.totalorder %s24_s20, %s404_s21  ;;  %p38_p2 = scmp.lt.s32.totalorder %s37_s22, %s404_s21 }
   0xf   :  { %s412_s23 = scalar_select %p27_p0, %s24_s20, 11 }
  0x10   :  { %s32_s24 = scalar_select %p26_p1, 1, 0 }
  0x11   :  { %s29_s25 = sld [smem:[#allocation3 + %s412_s23]]  ;;  %p39_p3 = scmp.lt.s32.totalorder %s37_s22, 11 }
  0x12   :  { %s44_s26 = scalar_select %p38_p2, 1, 0  ;;  %v33_v0 = vstv %s32_s24 }
  0x13   :  { %s710_s22 = smov (!%p39_p3, %s37_s22), 11  ;;  %s49_s27 = sadd.s32 2, %s24_s20  ;;  %vm426_vm0 = vcmp.eq.s32.totalorder %v33_v0, 1 }
  0x14   :  { %p62_p4 = scmp.lt.s32.totalorder %s404_s21, %s406_s0  ;;  %s41_s28 = sld [smem:[#allocation3 + %s710_s22]]  ;;  %v45_v4 = vstv %s44_s26 }
  0x15   :  { %p50_p5 = scmp.lt.s32.totalorder %s49_s27, %s404_s21  ;;  %p51_p6 = scmp.lt.s32.totalorder %s49_s27, 11  ;;  %vm439_vm1 = vcmp.eq.s32.totalorder %v45_v4, 1 }
  0x16   :  { %p63_p7 = scmp.lt.s32.totalorder %s404_s21, 11  ;;  %s73_s5 = sadd.s32 1, %s404_s21 }
  0x17   :  { %s30_s4 = scalar_lea.vmem %s682_s2, %s29_s25  ;;  %s712_s27 = smov (!%p51_p6, %s49_s27), 11 }
  0x18   :  { %v31_v1 = vld [vmem:[%s30_s4] sm:$0x1]  ;;  %s56_s6 = scalar_select %p50_p5, 1, 0 }
  0x19   :  { %v35_v3 = vsel %vm426_vm0, %v31_v1, 0.0  ;;  %s53_s7 = sld [smem:[#allocation3 + %s712_s27]]  ;;  %p74_p8 = scmp.lt.s32.totalorder %s73_s5, %s406_s0 }
  0x1a   :  { %s42_s10 = scalar_lea.vmem %s682_s2, %s41_s28  ;;  %p75_p9 = scmp.lt.s32.totalorder %s73_s5, 11  ;;  %v57_v9 = vstv %s56_s6 }
  0x1b   :  { %v43_v5 = vld [vmem:[%s42_s10] sm:$0x1]  ;;  %s446_s11 = scalar_select %p63_p7, %s404_s21, 11  ;;  %vm461_vm2 = vcmp.eq.s32.totalorder %v57_v9, 1 }
  0x1c   :  { %v47_v7 = vsel %vm439_vm1, %v43_v5, 0.0  ;;  %s68_s12 = scalar_select %p62_p4, 1, 0 }
  0x1d   :  { %v48_v8 = vadd.f32 %v47_v7, %v35_v3  ;;  %s65_s13 = sld [smem:[#allocation3 + %s446_s11]]  ;;  %s85_s14 = sadd.s32 2, %s404_s21 }
  0x1e   :  { %s455_s15 = scalar_select %p75_p9, %s73_s5, 11  ;;  %v69_v13 = vstv %s68_s12 }
  0x1f   :  { %s54_s18 = scalar_lea.vmem %s682_s2, %s53_s7  ;;  %p86_p10 = scmp.lt.s32.totalorder %s85_s14, %s406_s0  ;;  %vm477_vm3 = vcmp.eq.s32.totalorder %v69_v13, 1 }
  0x20   :  { %v55_v10 = vld [vmem:[%s54_s18] sm:$0x1]  ;;  %s77_s19 = sld [smem:[#allocation3 + %s455_s15]]  ;;  %p87_p11 = scmp.lt.s32.totalorder %s85_s14, 11 }
  0x21   :  { %v59_v12 = vsel %vm461_vm2, %v55_v10, 0.0  ;;  %s80_s20 = scalar_select %p74_p8, 1, 0 }
  0x22   :  { %v60_v14 = vadd.f32 %v59_v12, %v48_v8  ;;  %s470_s21 = scalar_select %p87_p11, %s85_s14, 11 }
  0x23   :  { %s66_s26 = scalar_lea.vmem %s682_s2, %s65_s13  ;;  %p98_p12 = scmp.lt.s32.totalorder %s406_s0, %s408_s1  ;;  %v81_v17 = vstv %s80_s20 }
  0x24   :  { %v67_v15 = vld [vmem:[%s66_s26] sm:$0x1]  ;;  %s89_s28 = sld [smem:[#allocation3 + %s470_s21]]  ;;  %p99_p13 = scmp.lt.s32.totalorder %s406_s0, 11  ;;  %vm491_vm4 = vcmp.eq.s32.totalorder %v81_v17, 1 }
  0x25   :  { %v71_v18 = vsel %vm477_vm3, %v67_v15, 0.0  ;;  %s92_s29 = scalar_select %p86_p10, 1, 0 }
  0x26   :  { %s78_s5 = scalar_lea.vmem %s682_s2, %s77_s19  ;;  %s109_s6 = sadd.s32 1, %s406_s0 }
  0x27   :  { %v79_v19 = vld [vmem:[%s78_s5] sm:$0x1]  ;;  %s496_s7 = scalar_select %p99_p13, %s406_s0, 11  ;;  %v93_v22 = vstv %s92_s29 }
  0x28   :  { %v83_v21 = vsel %vm491_vm4, %v79_v19, 0.0  ;;  %s104_s8 = scalar_select %p98_p12, 1, 0  ;;  %vm508_vm5 = vcmp.eq.s32.totalorder %v93_v22, 1 }
  0x29   :  { %v84_v23 = vadd.f32 %v83_v21, %v71_v18  ;;  %s101_s9 = sld [smem:[#allocation3 + %s496_s7]]  ;;  %p110_p0 = scmp.lt.s32.totalorder %s109_s6, %s408_s1 }
  0x2a   :  { %s90_s13 = scalar_lea.vmem %s682_s2, %s89_s28  ;;  %p111_p1 = scmp.lt.s32.totalorder %s109_s6, 11  ;;  %v105_v28 = vstv %s104_s8 }
  0x2b   :  { %v91_v24 = vld [vmem:[%s90_s13] sm:$0x1]  ;;  %s116_s14 = scalar_select %p110_p0, 1, 0  ;;  %vm523_vm6 = vcmp.eq.s32.totalorder %v105_v28, 1 }
  0x2c   :  { %v95_v26 = vsel %vm508_vm5, %v91_v24, 0.0  ;;  %s714_s6 = smov (!%p111_p1, %s109_s6), 11  ;;  %s121_s16 = sadd.s32 2, %s406_s0 }
  0x2d   :  { %v96_v27 = vadd.f32 %v95_v26, %v84_v23  ;;  %p133_p2 = scmp.lt.s32.totalorder %s408_s1, 12  ;;  %s113_s17 = sld [smem:[#allocation3 + %s714_s6]]  ;;  %v117_v34 = vstv %s116_s14 }
  0x2e   :  { %p122_p3 = scmp.lt.s32.totalorder %s121_s16, %s408_s1  ;;  %p123_p4 = scmp.lt.s32.totalorder %s121_s16, 11  ;;  %vm538_vm8 = vcmp.eq.s32.totalorder %v117_v34, 1 }
  0x2f   :  { %s102_s20 = scalar_lea.vmem %s682_s2, %s101_s9  ;;  %v169_v29 = vrot.slane %v96_v27, 7  ;;  %p134_p5 = scmp.lt.s32.totalorder %s408_s1, 11 }
  0x30   :  { %v103_v30 = vld [vmem:[%s102_s20] sm:$0x1]  ;;  %s128_s24 = scalar_select %p122_p3, 1, 0 }
  0x31   :  { %v107_v32 = vsel %vm523_vm6, %v103_v30, 0.0  ;;  %s716_s16 = smov (!%p123_p4, %s121_s16), 11  ;;  %v178_v33 = vsel %vm177_vm7, %v60_v14, %v169_v29  ;;  %s144_s0 = sadd.s32 1, %s408_s1 }
  0x32   :  { %s125_s25 = sld [smem:[#allocation3 + %s716_s16]]  ;;  %p145_p6 = scmp.lt.s32.totalorder %s144_s0, 12  ;;  %v129_v39 = vstv %s128_s24 }
  0x33   :  { %s114_s29 = scalar_lea.vmem %s682_s2, %s113_s17  ;;  %p146_p7 = scmp.lt.s32.totalorder %s144_s0, 11  ;;  %vm556_vm9 = vcmp.eq.s32.totalorder %v129_v39, 1 }
  0x34   :  { %v115_v35 = vld [vmem:[%s114_s29] sm:$0x1]  ;;  %s543_s30 = scalar_select %p134_p5, %s408_s1, 11 }
  0x35   :  { %v119_v37 = vsel %vm538_vm8, %v115_v35, 0.0  ;;  %s139_s4 = scalar_select %p133_p2, 1, 0 }
  0x36   :  { %v120_v38 = vadd.f32 %v119_v37, %v107_v32  ;;  %s136_s5 = sld [smem:[#allocation3 + %s543_s30]]  ;;  %s156_s8 = sadd.s32 2, %s408_s1 }
  0x37   :  { %s551_s9 = scalar_select %p146_p7, %s144_s0, 11  ;;  %v140_v43 = vstv %s139_s4 }
  0x38   :  { %s126_s13 = scalar_lea.vmem %s682_s2, %s125_s25  ;;  %p157_p8 = scmp.lt.s32.totalorder %s156_s8, 12  ;;  %vm570_vm10 = vcmp.eq.s32.totalorder %v140_v43, 1 }
  0x39   :  { %v127_v40 = vld [vmem:[%s126_s13] sm:$0x1]  ;;  %s148_s14 = sld [smem:[#allocation3 + %s551_s9]]  ;;  %p158_p9 = scmp.lt.s32.totalorder %s156_s8, 11 }
  0x3a   :  { %v131_v42 = vsel %vm556_vm9, %v127_v40, 0.0  ;;  %s151_s1 = scalar_select %p145_p6, 1, 0 }
  0x3b   :  { %v132_v44 = vadd.f32 %v131_v42, %v120_v38  ;;  %s564_s17 = scalar_select %p158_p9, %s156_s8, 11 }
  0x3c   :  { %s137_s20 = scalar_lea.vmem %s682_s2, %s136_s5  ;;  %s183_s24 = sadd.s32 12, %s412_s23  ;;  %v152_v47 = vstv %s151_s1 }
  0x3d   :  { %v138_v45 = vld [vmem:[%s137_s20] sm:$0x1]  ;;  %s160_s25 = sld [smem:[#allocation3 + %s564_s17]]  ;;  %v172_v48 = vrot.slane %v132_v44, 6  ;;  %s189_s0 = sadd.s32 12, %s710_s22  ;;  %vm583_vm12 = vcmp.eq.s32.totalorder %v152_v47, 1 }
  0x3e   :  { %v142_v49 = vsel %vm570_vm10, %v138_v45, 0.0  ;;  %s163_s26 = scalar_select %p157_p8, 1, 0 }
  0x3f   :  { %s149_s29 = scalar_lea.vmem %s682_s2, %s148_s14  ;;  %v180_v50 = vsel %vm179_vm11, %v178_v33, %v172_v48  ;;  %s184_s4 = sld [smem:[#allocation3 + %s183_s24]] }
  0x40   :  { %v150_v51 = vld [vmem:[%s149_s29] sm:$0x1]  ;;  %s190_s22 = sld [smem:[#allocation3 + %s189_s0]]  ;;  %s195_s5 = sadd.s32 12, %s712_s27  ;;  %v164_v54 = vstv %s163_s26 }
  0x41   :  { %v154_v53 = vsel %vm583_vm12, %v150_v51, 0.0  ;;  %s590_s8 = sld [smem:[#allocation3 + %s195_s5]]  ;;  %s201_s10 = sadd.s32 12, %s446_s11  ;;  %vm597_vm13 = vcmp.eq.s32.totalorder %v164_v54, 1 }
  0x42   :  { %v155_v55 = vadd.f32 %v154_v53, %v142_v49  ;;  %s202_s12 = sld [smem:[#allocation3 + %s201_s10]]  ;;  %s207_s13 = sadd.s32 12, %s455_s15 }
  0x43   :  { %s161_s18 = scalar_lea.vmem %s682_s2, %s160_s25  ;;  %s208_s19 = sld [smem:[#allocation3 + %s207_s13]] }
  0x44   :  { %v162_v56 = vld [vmem:[%s161_s18] sm:$0x1]  ;;  %s213_s27 = sadd.s32 12, %s470_s21  ;;  %s219_s20 = sadd.s32 12, %s496_s7 }
  0x45   :  { %v166_v58 = vsel %vm597_vm13, %v162_v56, 0.0  ;;  %s185_s15 = scalar_lea.vmem %s682_s2, %s184_s4  ;;  %s214_s0 = sld [smem:[#allocation3 + %s213_s27]] }
  0x46   :  { %v167_v59 = vadd.f32 %v166_v58, %v155_v55  ;;  %s191_s28 = scalar_lea.vmem %s682_s2, %s190_s22  ;;  %s220_s23 = sld [smem:[#allocation3 + %s219_s20]]  ;;  %v186_v61 = vld [vmem:[%s185_s15] sm:$0x1] }
  0x47   :  { %s197_s21 = scalar_lea.vmem %s682_s2, %s590_s8  ;;  %s225_s7 = sadd.s32 12, %s714_s6  ;;  %v192_v62 = vld [vmem:[%s191_s28] sm:$0x1]  ;;  %v187_v4 = vsel %vm426_vm0, %v186_v61, 0.0  ;;  %vm273_vm0 = vcmask 60416  }
  0x48   :  { %v175_v60 = vrot.slane %v167_v59, 5  ;;  %s203_s4 = scalar_lea.vmem %s682_s2, %s202_s12  ;;  %s619_s14 = sld [smem:[#allocation3 + %s225_s7]]  ;;  %v193_v5 = vsel %vm439_vm1, %v192_v62, 0.0  ;;  %v198_v8 = vld [vmem:[%s197_s21] sm:$0x1] }
  0x49   :  { %v204_v63 = vld [vmem:[%s203_s4] sm:$0x1]  ;;  %s209_s18 = scalar_lea.vmem %s682_s2, %s208_s19  ;;  %s231_s27 = sadd.s32 12, %s716_s16  ;;  %v194_v12 = vadd.f32 %v193_v5, %v187_v4  ;;  %v199_v15 = vsel %vm461_vm2, %v198_v8, 0.0 }
  0x4a   :  { %v182_v0 = vsel %vm181_vm14, %v180_v50, %v175_v60  ;;  %v205_v1 = vsel %vm477_vm3, %v204_v63, 0.0  ;;  %v210_v3 = vld [vmem:[%s209_s18] sm:$0x1]  ;;  %s232_s6 = sld [smem:[#allocation3 + %s231_s27]]  ;;  %s237_s8 = sadd.s32 12, %s543_s30 }
  0x4b   :  { %v211_v7 = vsel %vm491_vm4, %v210_v3, 0.0  ;;  %s215_s19 = scalar_lea.vmem %s682_s2, %s214_s0  ;;  %s238_s20 = sld [smem:[#allocation3 + %s237_s8]]  ;;  %v200_v20 = vadd.f32 %v199_v15, %v194_v12 }
  0x4c   :  { %v212_v9 = vadd.f32 %v211_v7, %v205_v1  ;;  %v216_v10 = vld [vmem:[%s215_s19] sm:$0x1]  ;;  %s221_s24 = scalar_lea.vmem %s682_s2, %s220_s23  ;;  %s243_s15 = sadd.s32 12, %s551_s9 }
  0x4d   :  { %v217_v2 = vsel %vm508_vm5, %v216_v10, 0.0  ;;  %v222_v6 = vld [vmem:[%s221_s24] sm:$0x1]  ;;  %s244_s26 = sld [smem:[#allocation3 + %s243_s15]]  ;;  %s249_s25 = sadd.s32 12, %s564_s17 }
  0x4e   :  { %v218_v13 = vadd.f32 %v217_v2, %v212_v9  ;;  %v223_v14 = vsel %vm523_vm6, %v222_v6, 0.0  ;;  %s227_s29 = scalar_lea.vmem %s682_s2, %s619_s14  ;;  %s250_s5 = sld [smem:[#allocation3 + %s249_s25]] }
  0x4f   :  { %v228_v16 = vld [vmem:[%s227_s29] sm:$0x1]  ;;  %s376_s27 = smov 4   ;;  %s282_s12 = sshll.u32 %s683_s3, 4  ;;  %s283_s12 = int_to_ptr.hbm [resolvable:$true] %s282_s12 }
  0x50   :  { %v229_v17 = vsel %vm538_vm8, %v228_v16, 0.0  ;;  %s233_s17 = scalar_lea.vmem %s682_s2, %s232_s6  ;;  %v256_v22 = vrot.slane %v218_v13, 7 }
  0x51   :  { %v230_v18 = vadd.f32 %v229_v17, %v223_v14  ;;  %v234_v19 = vld [vmem:[%s233_s17] sm:$0x1]  ;;  %s239_s10 = scalar_lea.vmem %s682_s2, %s238_s20 }
  0x52   :  { %v235_v21 = vsel %vm556_vm9, %v234_v19, 0.0  ;;  %v240_v11 = vld [vmem:[%s239_s10] sm:$0x1]  ;;  %v264_v31 = vsel %vm177_vm7, %v200_v20, %v256_v22 }
  0x53   :  { %v236_v23 = vadd.f32 %v235_v21, %v230_v18  ;;  %v241_v24 = vsel %vm570_vm10, %v240_v11, 0.0  ;;  %s245_s14 = scalar_lea.vmem %s682_s2, %s244_s26 }
  0x54   :  { %v246_v25 = vld [vmem:[%s245_s14] sm:$0x1]  ;;  %s251_s18 = scalar_lea.vmem %s682_s2, %s250_s5  ;;  %s377_s2 = smov [#allocation5]  }
  0x55   :  { %v247_v26 = vsel %vm583_vm12, %v246_v25, 0.0  ;;  %v252_v27 = vld [vmem:[%s251_s18] sm:$0x1]  ;;  %v259_v28 = vrot.slane %v236_v23, 6  ;;  %s280_s6 = sshll.u32 %s377_s2, 4  ;;  %s281_s6 = int_to_ptr.vmem [resolvable:$true] %s280_s6 }
  0x56   :  { %v248_v29 = vadd.f32 %v247_v26, %v241_v24  ;;  %v253_v30 = vsel %vm597_vm13, %v252_v27, 0.0 }
  0x57   :  { %v265_v33 = vsel %vm179_vm11, %v264_v31, %v259_v28 }
  0x58   :  { %v254_v32 = vadd.f32 %v253_v30, %v248_v29 }
  0x5a   :  { %v262_v34 = vrot.slane %v254_v32, 5 }
  0x5c   :  { %v266_v35 = vsel %vm181_vm14, %v265_v33, %v262_v34 }
  0x5d   :  { %268 = vrot.lane.b32.xlu0 %v266_v35, %s376_s27 }
  0xcf   :  { %v269_v36 = vpop.permute.xlu0 %268 }
  0xd0   :  { %v272_v37 = vsel %vm271_vm15, %v182_v0, %v269_v36 }
  0xd1   :  { %274 = vst.msk [vmem:[#allocation5] sm:$0xf] %vm273_vm0, %v272_v37 }
  0xd2   :  { %285 = dma.vmem_to_hbm [thread:$0]  %s281_s6, 64, %s283_s12, [#allocation6]  }
  0xd3   :  { %372 = dma.done.wait [#allocation6], 64  }
  0xd4   :  { %373 = vsyncadd [#allocation6], 4294967232 }
  0xd5   :  { %290 = vsyncpa [#allocation6], 1 }

</bundles_post_ra>
